<compile_context>
chip_gen: v5e
topology: v5e:2x2
jax: 0.10.0
libtpu: 0.0.40
codegen_flags: <defaults>
</compile_context>

<pallas_src>
import functools

import jax
import jax.numpy as jnp
from jax.experimental import pallas as pl
from jax.experimental.pallas import tpu as pltpu


def _gnn_kernel(xcol_ref, sblk_ref, h1_ref, h2_ref, h3_ref, o_ref, *,
                K1, K2, K3):
    # xcol_ref: (B*N, 1)        row-stacked node signal (rows grouped by batch)
    # sblk_ref: (B*N, B*N)      block-diagonal graph shift operator
    # h1_ref  : (K1, F1)        layer-1 taps (Fin = 1 squeezed out)
    # h2_ref  : (K2, F1, F2)
    # h3_ref  : (K3, F2, F3)
    # o_ref   : (B*N, F3)
    Sb = sblk_ref[...]

    # ---- layer 1 (Fin = 1): matvec S-recursion + VPU outer-product taps ----
    u = xcol_ref[...]                                   # (BN, 1)
    acc = u * h1_ref[0:1, :]                            # (BN,1)*(1,F1) -> (BN,F1)
    for k in range(1, K1):
        u = jnp.dot(Sb, u, preferred_element_type=jnp.float32)
        acc = acc + u * h1_ref[k:k + 1, :]
    y = jnp.maximum(acc, 0.0)                           # fused ReLU, (BN, F1)

    # ---- layer 2: per-tap MXU matmul accumulation ----
    z = y
    acc = jnp.dot(z, h2_ref[0], preferred_element_type=jnp.float32)
    for k in range(1, K2):
        z = jnp.dot(Sb, z, preferred_element_type=jnp.float32)
        acc = acc + jnp.dot(z, h2_ref[k], preferred_element_type=jnp.float32)
    y = jnp.maximum(acc, 0.0)                           # fused ReLU, (BN, F2)

    # ---- layer 3: same, no ReLU ----
    z = y
    acc = jnp.dot(z, h3_ref[0], preferred_element_type=jnp.float32)
    for k in range(1, K3):
        z = jnp.dot(Sb, z, preferred_element_type=jnp.float32)
        acc = acc + jnp.dot(z, h3_ref[k], preferred_element_type=jnp.float32)

    # single contiguous HBM-bound store
    o_ref[...] = acc.astype(o_ref.dtype)


def gnn_forward(x, S, params):
    """x: (B, N), S: (N, N), params = (H1, H2, H3) -> (B, N, Fout3)."""
    H1, H2, H3 = params
    B, N = x.shape
    K1, Fin1, F1 = H1.shape
    K2, _, F2 = H2.shape
    K3, _, F3 = H3.shape
    assert Fin1 == 1, "GNN.forward reshapes x to (B, N, 1), so F[0] must be 1"
    BN = B * N

    # Layout plumbing only (placement / reshape, no compute hoisted):
    xcol = jnp.asarray(x, jnp.float32).reshape(BN, 1)
    s32 = jnp.asarray(S, jnp.float32)
    sblk = jnp.zeros((BN, BN), jnp.float32)
    for b in range(B):                                   # block-diag placement
        sblk = sblk.at[b * N:(b + 1) * N, b * N:(b + 1) * N].set(s32)
    h1 = jnp.asarray(H1, jnp.float32).reshape(K1, F1)    # Fin = 1 squeezed
    h2 = jnp.asarray(H2, jnp.float32)
    h3 = jnp.asarray(H3, jnp.float32)

    kernel = functools.partial(_gnn_kernel, K1=K1, K2=K2, K3=K3)

    flops = (
        2 * (K1 - 1) * BN * BN * 1 + 2 * K1 * BN * F1            # layer 1
        + 2 * (K2 - 1) * BN * BN * F1 + 2 * K2 * BN * F1 * F2    # layer 2
        + 2 * (K3 - 1) * BN * BN * F2 + 2 * K3 * BN * F2 * F3    # layer 3
    )
    bytes_accessed = 4 * (xcol.size + sblk.size + h1.size + h2.size + h3.size
                          + BN * F3)

    out = pl.pallas_call(
        kernel,
        out_shape=jax.ShapeDtypeStruct((BN, F3), jnp.float32),
        in_specs=[pl.BlockSpec(memory_space=pltpu.MemorySpace.VMEM)
                  for _ in range(5)],
        out_specs=pl.BlockSpec(memory_space=pltpu.MemorySpace.VMEM),
        cost_estimate=pl.CostEstimate(flops=flops, transcendentals=0,
                                      bytes_accessed=bytes_accessed),
    )(xcol, sblk, h1, h2, h3)
    return out.reshape(B, N, F3)


def gnn_reference(x, S, params):
    """Pure-JAX reference mirroring the PyTorch GFilter_func semantics."""
    def gf(x, S, H):
        res = 0.0
        Sk = jnp.eye(S.shape[0], dtype=jnp.float32)
        for k in range(H.shape[0]):
            res = res + jnp.einsum('ij,bjp,pq->biq', Sk, x, H[k])
            Sk = Sk @ S
        return res
    H1, H2, H3 = params
    x = x.reshape(x.shape[0], x.shape[1], 1)
    x = jax.nn.relu(gf(x, S, H1))
    x = jax.nn.relu(gf(x, S, H2))
    return gf(x, S, H3)


if __name__ == "__main__":
    key = jax.random.PRNGKey(0)
    B, N = 2, 16
    Klist = [3, 3, 2]
    Feat = [1, 32, 32, 8]

    k_x, k_s, k_h1, k_h2, k_h3 = jax.random.split(key, 5)
    x = jax.random.normal(k_x, (B, N), dtype=jnp.float32)

    # symmetric graph shift operator
    A = jax.random.normal(k_s, (N, N), dtype=jnp.float32)
    S = 0.5 * (A + A.T) / N

    # GFilter parameters: H ~ randn(K, Fin, Fout) * 0.1
    H1 = jax.random.normal(k_h1, (Klist[0], Feat[0], Feat[1]), dtype=jnp.float32) * 0.1
    H2 = jax.random.normal(k_h2, (Klist[1], Feat[1], Feat[2]), dtype=jnp.float32) * 0.1
    H3 = jax.random.normal(k_h3, (Klist[2], Feat[2], Feat[3]), dtype=jnp.float32) * 0.1
    params = (H1, H2, H3)

    out = gnn_forward(x, S, params)
    out = jax.block_until_ready(out)

    ref = gnn_reference(x, S, params)
    assert out.shape == (B, N, Feat[3]), out.shape
    assert jnp.allclose(out, ref, atol=1e-4, rtol=1e-4), float(jnp.max(jnp.abs(out - ref)))

    print("KERNEL_OK")
</pallas_src>

<mosaic_0001>
module attributes {stable_mosaic.version = 11 : i64} {
  func.func @_gnn_kernel(%arg0: memref<32x1xf32, #tpu.memory_space<vmem>>, %arg1: memref<32x32xf32, #tpu.memory_space<vmem>>, %arg2: memref<3x32xf32, #tpu.memory_space<vmem>>, %arg3: memref<3x32x32xf32, #tpu.memory_space<vmem>>, %arg4: memref<2x32x8xf32, #tpu.memory_space<vmem>>, %arg5: memref<32x8xf32, #tpu.memory_space<vmem>>) attributes {dimension_semantics = [], scalar_prefetch = 0 : i64, scratch_operands = 0 : i64, tpu.core_type = #tpu.core_type<tc>} {
    %c0 = arith.constant 0 : index
    %c0_0 = arith.constant 0 : index
    %0 = vector.load %arg1[%c0, %c0_0] : memref<32x32xf32, #tpu.memory_space<vmem>>, vector<32x32xf32>
    %c0_1 = arith.constant 0 : index
    %c0_2 = arith.constant 0 : index
    %1 = vector.load %arg0[%c0_1, %c0_2] : memref<32x1xf32, #tpu.memory_space<vmem>>, vector<32x1xf32>
    %c0_3 = arith.constant 0 : index
    %c0_4 = arith.constant 0 : index
    %2 = vector.load %arg2[%c0_3, %c0_4] : memref<3x32xf32, #tpu.memory_space<vmem>>, vector<1x32xf32>
    %3 = vector.broadcast %1 : vector<32x1xf32> to vector<32x32xf32>
    %4 = vector.broadcast %2 : vector<1x32xf32> to vector<32x32xf32>
    %5 = arith.mulf %3, %4 : vector<32x32xf32>
    %cst = arith.constant dense<0.000000e+00> : vector<32x1xf32>
    %6 = tpu.matmul %0, %1, %cst {dimension_numbers = #tpu.dot_dimension_numbers<[1], [0], [0], [1], [0, 0, 1, 1], [], []>} : vector<32x32xf32>, vector<32x1xf32>, vector<32x1xf32> -> vector<32x1xf32>
    %c1 = arith.constant 1 : index
    %c0_5 = arith.constant 0 : index
    %7 = vector.load %arg2[%c1, %c0_5] : memref<3x32xf32, #tpu.memory_space<vmem>>, vector<1x32xf32>
    %8 = vector.broadcast %6 : vector<32x1xf32> to vector<32x32xf32>
    %9 = vector.broadcast %7 : vector<1x32xf32> to vector<32x32xf32>
    %10 = arith.mulf %8, %9 : vector<32x32xf32>
    %11 = arith.addf %5, %10 : vector<32x32xf32>
    %cst_6 = arith.constant dense<0.000000e+00> : vector<32x1xf32>
    %12 = tpu.matmul %0, %6, %cst_6 {dimension_numbers = #tpu.dot_dimension_numbers<[1], [0], [0], [1], [0, 0, 1, 1], [], []>} : vector<32x32xf32>, vector<32x1xf32>, vector<32x1xf32> -> vector<32x1xf32>
    %c2 = arith.constant 2 : index
    %c0_7 = arith.constant 0 : index
    %13 = vector.load %arg2[%c2, %c0_7] : memref<3x32xf32, #tpu.memory_space<vmem>>, vector<1x32xf32>
    %14 = vector.broadcast %12 : vector<32x1xf32> to vector<32x32xf32>
    %15 = vector.broadcast %13 : vector<1x32xf32> to vector<32x32xf32>
    %16 = arith.mulf %14, %15 : vector<32x32xf32>
    %17 = arith.addf %11, %16 : vector<32x32xf32>
    %cst_8 = arith.constant 0.000000e+00 : f32
    %18 = vector.broadcast %cst_8 : f32 to vector<32x32xf32>
    %19 = arith.maximumf %17, %18 : vector<32x32xf32>
    %c0_9 = arith.constant 0 : index
    %c0_10 = arith.constant 0 : index
    %c0_11 = arith.constant 0 : index
    %20 = vector.load %arg3[%c0_9, %c0_10, %c0_11] : memref<3x32x32xf32, #tpu.memory_space<vmem>>, vector<1x32x32xf32>
    %21 = vector.shape_cast %20 : vector<1x32x32xf32> to vector<32x32xf32>
    %cst_12 = arith.constant dense<0.000000e+00> : vector<32x32xf32>
    %22 = tpu.matmul %19, %21, %cst_12 {dimension_numbers = #tpu.dot_dimension_numbers<[1], [0], [0], [1], [0, 0, 1, 1], [], []>} : vector<32x32xf32>, vector<32x32xf32>, vector<32x32xf32> -> vector<32x32xf32>
    %cst_13 = arith.constant dense<0.000000e+00> : vector<32x32xf32>
    %23 = tpu.matmul %0, %19, %cst_13 {dimension_numbers = #tpu.dot_dimension_numbers<[1], [0], [0], [1], [0, 0, 1, 1], [], []>} : vector<32x32xf32>, vector<32x32xf32>, vector<32x32xf32> -> vector<32x32xf32>
    %c1_14 = arith.constant 1 : index
    %c0_15 = arith.constant 0 : index
    %c0_16 = arith.constant 0 : index
    %24 = vector.load %arg3[%c1_14, %c0_15, %c0_16] : memref<3x32x32xf32, #tpu.memory_space<vmem>>, vector<1x32x32xf32>
    %25 = vector.shape_cast %24 : vector<1x32x32xf32> to vector<32x32xf32>
    %cst_17 = arith.constant dense<0.000000e+00> : vector<32x32xf32>
    %26 = tpu.matmul %23, %25, %cst_17 {dimension_numbers = #tpu.dot_dimension_numbers<[1], [0], [0], [1], [0, 0, 1, 1], [], []>} : vector<32x32xf32>, vector<32x32xf32>, vector<32x32xf32> -> vector<32x32xf32>
    %27 = arith.addf %22, %26 : vector<32x32xf32>
    %cst_18 = arith.constant dense<0.000000e+00> : vector<32x32xf32>
    %28 = tpu.matmul %0, %23, %cst_18 {dimension_numbers = #tpu.dot_dimension_numbers<[1], [0], [0], [1], [0, 0, 1, 1], [], []>} : vector<32x32xf32>, vector<32x32xf32>, vector<32x32xf32> -> vector<32x32xf32>
    %c2_19 = arith.constant 2 : index
    %c0_20 = arith.constant 0 : index
    %c0_21 = arith.constant 0 : index
    %29 = vector.load %arg3[%c2_19, %c0_20, %c0_21] : memref<3x32x32xf32, #tpu.memory_space<vmem>>, vector<1x32x32xf32>
    %30 = vector.shape_cast %29 : vector<1x32x32xf32> to vector<32x32xf32>
    %cst_22 = arith.constant dense<0.000000e+00> : vector<32x32xf32>
    %31 = tpu.matmul %28, %30, %cst_22 {dimension_numbers = #tpu.dot_dimension_numbers<[1], [0], [0], [1], [0, 0, 1, 1], [], []>} : vector<32x32xf32>, vector<32x32xf32>, vector<32x32xf32> -> vector<32x32xf32>
    %32 = arith.addf %27, %31 : vector<32x32xf32>
    %cst_23 = arith.constant 0.000000e+00 : f32
    %33 = vector.broadcast %cst_23 : f32 to vector<32x32xf32>
    %34 = arith.maximumf %32, %33 : vector<32x32xf32>
    %c0_24 = arith.constant 0 : index
    %c0_25 = arith.constant 0 : index
    %c0_26 = arith.constant 0 : index
    %35 = vector.load %arg4[%c0_24, %c0_25, %c0_26] : memref<2x32x8xf32, #tpu.memory_space<vmem>>, vector<1x32x8xf32>
    %36 = vector.shape_cast %35 : vector<1x32x8xf32> to vector<32x8xf32>
    %cst_27 = arith.constant dense<0.000000e+00> : vector<32x8xf32>
    %37 = tpu.matmul %34, %36, %cst_27 {dimension_numbers = #tpu.dot_dimension_numbers<[1], [0], [0], [1], [0, 0, 1, 1], [], []>} : vector<32x32xf32>, vector<32x8xf32>, vector<32x8xf32> -> vector<32x8xf32>
    %cst_28 = arith.constant dense<0.000000e+00> : vector<32x32xf32>
    %38 = tpu.matmul %0, %34, %cst_28 {dimension_numbers = #tpu.dot_dimension_numbers<[1], [0], [0], [1], [0, 0, 1, 1], [], []>} : vector<32x32xf32>, vector<32x32xf32>, vector<32x32xf32> -> vector<32x32xf32>
    %c1_29 = arith.constant 1 : index
    %c0_30 = arith.constant 0 : index
    %c0_31 = arith.constant 0 : index
    %39 = vector.load %arg4[%c1_29, %c0_30, %c0_31] : memref<2x32x8xf32, #tpu.memory_space<vmem>>, vector<1x32x8xf32>
    %40 = vector.shape_cast %39 : vector<1x32x8xf32> to vector<32x8xf32>
    %cst_32 = arith.constant dense<0.000000e+00> : vector<32x8xf32>
    %41 = tpu.matmul %38, %40, %cst_32 {dimension_numbers = #tpu.dot_dimension_numbers<[1], [0], [0], [1], [0, 0, 1, 1], [], []>} : vector<32x32xf32>, vector<32x8xf32>, vector<32x8xf32> -> vector<32x8xf32>
    %42 = arith.addf %37, %41 : vector<32x8xf32>
    %c0_33 = arith.constant 0 : index
    %c0_34 = arith.constant 0 : index
    %43 = vector.load %arg5[%c0_33, %c0_34] : memref<32x8xf32, #tpu.memory_space<vmem>>, vector<32x8xf32>
    tpu.vector_store %arg5[%c0_33, %c0_34], %42 {strides = array<i32>} : memref<32x8xf32, #tpu.memory_space<vmem>>, vector<32x8xf32>,
    return
  }
}

</mosaic_0001>

<bundles_post_ra>
// kernel: tpu_custom_call.1
= control target key start
LH: loop header
LB: loop body
LE: loop exit
PB: predicated region body
PF: predicated region fallthrough
CT: control target
= control target key end

     0   :  { %10 = vsyncpa [#allocation3], 0  ;;  %s634_s21 = smov [#allocation2]   ;;  %s635_s23 = smov 128   ;;  %s832_s0 = inlined_call_operand.vmem [shape: f32[32,1], index: 0, kind: input, shape index: {}]   ;;  %s833_s1 = inlined_call_operand.hbm [shape: f32[32,32], index: 1, kind: input, shape index: {}]   ;;  %s834_s2 = inlined_call_operand.vmem [shape: f32[3,32], index: 2, kind: input, shape index: {}]   ;;  %s835_s3 = inlined_call_operand.vmem [shape: f32[3,32,32], index: 3, kind: input, shape index: {}]   ;;  %s836_s4 = inlined_call_operand.vmem [shape: f32[2,32,8], index: 4, kind: input, shape index: {}]   ;;  %s837_s5 = inlined_call_operand.vmem [shape: f32[32,8], index: 5, kind: output, shape index: {}]  }
   0x1   :  { %s17_s20 = sshll.u32 %s833_s1, 4  ;;  %s19_s22 = sshll.u32 %s634_s21, 4  ;;  %s18_s20 = int_to_ptr.hbm [resolvable:$true] %s17_s20  ;;  %s20_s22 = int_to_ptr.vmem [resolvable:$true] %s19_s22 }
   0x2   :  { %s636_s24 = smov 8  }
   0x3   :  { %25 = dma.hbm_to_vmem [thread:$0]  %s18_s20, 512, %s20_s22, [#allocation3], %s635_s23, %s635_s23, %s636_s24  }
   0x4   :  { %632 = dma.done.wait [#allocation3], 512  }
   0x5   :  { %633 = vsyncadd [#allocation3], 4294966784  ;;  %v637_v0 = vmov 0   ;;  %v43_v1 = vld [vmem:[%s832_s0 + $0x18] sm:$0xff]  ;;  %v42_v2 = vld [vmem:[%s832_s0 + $0x10] sm:$0xff]  ;;  %vm70_vm0 = vcmask 261120  }
   0x6   :  { %603 = vset.pattern.permute.xlu1 %v637_v0  ;;  %602 = vset.pattern.permute.xlu0 %v637_v0  ;;  %v41_v3 = vld [vmem:[%s832_s0 + $0x8] sm:$0xff]  ;;  %v40_v4 = vld [vmem:[%s832_s0] sm:$0xff]  ;;  %v685_v6 = vld [vmem:[#allocation2 + $0x10] sm:$0xff]  ;;  %vm528_vm1 = vcmask 64512  }
   0x7   :  { %604 = vset.pattern.permute.xlu2 %v637_v0  ;;  %95 = vmatpush.msra.mxu0 %v43_v1  ;;  %v683_v5 = vld [vmem:[#allocation2] sm:$0xff]  ;;  %v691_v7 = vld [vmem:[#allocation2 + $0x8] sm:$0xff]  ;;  %v693_v8 = vld [vmem:[#allocation2 + $0x18] sm:$0xff] }
   0x8   :  { %590 = vmatpush.msra.mxu2 %v43_v1  ;;  %57 = vperm.xlu1 %603, %v42_v2   ;;  %v208_v18 = vld [vmem:[%s835_s3 + $0x18] sm:$0xff]  ;;  %v207_v19 = vld [vmem:[%s835_s3 + $0x10] sm:$0xff]  ;;  %v206_v20 = vld [vmem:[%s835_s3 + $0x8] sm:$0xff] }
   0x9   :  { %62 = vperm.xlu0 %602, %v43_v1   ;;  %96 = vmatpush.msra.mxu0 %v42_v2  ;;  %v205_v21 = vld [vmem:[%s835_s3] sm:$0xff]  ;;  %v553_v60 = vld [vmem:[%s835_s3 + $0x38] sm:$0xff]  ;;  %v552_v61 = vld [vmem:[%s835_s3 + $0x30] sm:$0xff] }
   0xa   :  { %591 = vmatpush.msra.mxu2 %v42_v2  ;;  %52 = vperm.xlu2 %604, %v41_v3   ;;  %v605_v26 = vld [vmem:[%s834_s2] ss:$0 sm:$0xff]  ;;  %v606_v27 = vld [vmem:[%s834_s2 + $0x1] ss:$0 sm:$0xff]  ;;  %v607_v30 = vld [vmem:[%s834_s2 + $0x2] ss:$0 sm:$0xff] }
   0xb   :  { %97 = vmatpush.msra.mxu0 %v41_v3  ;;  %v551_v62 = vld [vmem:[%s835_s3 + $0x28] sm:$0xff]  ;;  %v550_v63 = vld [vmem:[%s835_s3 + $0x20] sm:$0xff] }
   0xc   :  { %592 = vmatpush.msra.mxu2 %v41_v3 }
   0xd   :  { %98 = vmatpush.msra.mxu0 %v40_v4 }
   0xe   :  { %593 = vmatpush.msra.mxu2 %v40_v4  ;;  %538 = vmatmul.msk.f32.vlgmr.msra.gmra.mxu0 %vm70_vm0, %v683_v5 }
   0xf   :  { %540 = vmatmul.msk.f32.vlgmr.msra.gmra.mxu2 %vm70_vm0, %v685_v6  ;;  %308 = vmatpush.msrb.mxu0 %v208_v18  ;;  %v409_v18 = vld [vmem:[%s836_s4 + $0x8] sm:$0xff] }
  0x11   :  { %309 = vmatpush.msrb.mxu0 %v207_v19  ;;  %v408_v19 = vld [vmem:[%s836_s4] sm:$0xff] }
  0x12   :  { %47 = vperm.xlu2 %604, %v40_v4   ;;  %v569_v4 = vld [vmem:[%s835_s3 + $0x58] sm:$0xff] }
  0x13   :  { %310 = vmatpush.msrb.mxu0 %v206_v20 }
  0x15   :  { %311 = vmatpush.msrb.mxu0 %v205_v21 }
  0x16   :  { %539 = vmatmul.msk.f32.gmra.mxu0 %vm70_vm0, %v691_v7 }
  0x17   :  { %541 = vmatmul.msk.f32.gmra.mxu2 %vm70_vm0, %v693_v8 }
  0x64   :  { %v53_v23 = vpop.permute.xlu2 %52 }
  0x65   :  { %v67_v53 = vmul.f32 %v605_v26, %v53_v23 }
  0x6c   :  { %v48_v25 = vpop.permute.xlu2 %47 }
  0x6d   :  { %v66_v37 = vmul.f32 %v605_v26, %v48_v25 }
  0x7a   :  { %v58_v31 = vpop.permute.xlu1 %57 }
  0x7b   :  { %v63_v17 = vpop.permute.xlu0 %62  ;;  %v68_v45 = vmul.f32 %v605_v26, %v58_v31 }
  0x7c   :  { %v69_v28 = vmul.f32 %v605_v26, %v63_v17  ;;  %v410_v17 = vld [vmem:[%s836_s4 + $0x10] sm:$0xff] }
  0x8b   :  { %v100_v9 = vpop.f32.mrf.mxu0 }
  0x92   :  { %v106_v10 = vpop.f32.mrf.mxu2 }
  0x93   :  { %125 = vperm.xlu1 %603, %v106_v10   ;;  %v103_v11 = vpop.f32.mrf.mxu0 }
  0x94   :  { %120 = vperm.xlu0 %602, %v103_v11  }
  0x9a   :  { %v109_v12 = vpop.f32.mrf.mxu2 }
  0x9b   :  { %154 = vmatpush.msra.mxu1 %v109_v12  ;;  %594 = vmatpush.msra.mxu3 %v109_v12 }
  0x9c   :  { %130 = vperm.xlu0 %602, %v109_v12   ;;  %v411_v12 = vld [vmem:[%s836_s4 + $0x18] sm:$0xff] }
  0x9d   :  { %155 = vmatpush.msra.mxu1 %v106_v10  ;;  %595 = vmatpush.msra.mxu3 %v106_v10  ;;  %v567_v10 = vld [vmem:[%s835_s3 + $0x48] sm:$0xff] }
  0x9f   :  { %156 = vmatpush.msra.mxu1 %v103_v11  ;;  %596 = vmatpush.msra.mxu3 %v103_v11  ;;  %v566_v11 = vld [vmem:[%s835_s3 + $0x40] sm:$0xff] }
  0xa1   :  { %157 = vmatpush.msra.mxu1 %v100_v9  ;;  %597 = vmatpush.msra.mxu3 %v100_v9 }
  0xa2   :  { %544 = vmatmul.msk.f32.vlgmr.msra.gmra.mxu3 %vm70_vm0, %v685_v6  ;;  %542 = vmatmul.msk.f32.vlgmr.msra.gmra.mxu1 %vm70_vm0, %v683_v5 }
  0xa3   :  { %267 = vmatpush.msrb.mxu3 %v553_v60 }
  0xa4   :  { %115 = vperm.xlu0 %602, %v100_v9   ;;  %v568_v9 = vld [vmem:[%s835_s3 + $0x50] sm:$0xff] }
  0xa5   :  { %268 = vmatpush.msrb.mxu3 %v552_v61 }
  0xa7   :  { %269 = vmatpush.msrb.mxu3 %v551_v62 }
  0xa9   :  { %270 = vmatpush.msrb.mxu3 %v550_v63 }
  0xaa   :  { %545 = vmatmul.msk.f32.gmra.mxu3 %vm70_vm0, %v693_v8  ;;  %543 = vmatmul.msk.f32.gmra.mxu1 %vm70_vm0, %v691_v7 }
 0x105   :  { %v126_v40 = vpop.permute.xlu1 %125 }
 0x106   :  { %v121_v22 = vpop.permute.xlu0 %120  ;;  %v136_v46 = vmul.f32 %v606_v27, %v126_v40 }
 0x107   :  { %v135_v52 = vmul.f32 %v606_v27, %v121_v22 }
 0x108   :  { %v140_v49 = vadd.f32 %v136_v46, %v68_v45  ;;  %v580_v45 = vld [vmem:[%s836_s4 + $0x30] sm:$0xff] }
 0x109   :  { %v139_v56 = vadd.f32 %v135_v52, %v67_v53 }
 0x10e   :  { %v131_v24 = vpop.permute.xlu0 %130 }
 0x10f   :  { %v137_v29 = vmul.f32 %v606_v27, %v131_v24 }
 0x111   :  { %v141_v33 = vadd.f32 %v137_v29, %v69_v28 }
 0x116   :  { %v116_v35 = vpop.permute.xlu0 %115 }
 0x117   :  { %v134_v38 = vmul.f32 %v606_v27, %v116_v35 }
 0x119   :  { %v138_v42 = vadd.f32 %v134_v38, %v66_v37 }
 0x11f   :  { %v159_v13 = vpop.f32.mrf.mxu1 }
 0x125   :  { %v165_v14 = vpop.f32.mrf.mxu3 }
 0x126   :  { %184 = vperm.xlu1 %603, %v165_v14  }
 0x127   :  { %v162_v15 = vpop.f32.mrf.mxu1 }
 0x12d   :  { %v168_v16 = vpop.f32.mrf.mxu3 }
 0x12e   :  { %189 = vperm.xlu2 %604, %v168_v16   ;;  %179 = vperm.xlu1 %603, %v162_v15  }
 0x136   :  { %174 = vperm.xlu2 %604, %v159_v13  }
 0x188   :  { %v190_v32 = vpop.permute.xlu2 %189 }
 0x189   :  { %v196_v34 = vmul.f32 %v607_v30, %v190_v32 }
 0x18b   :  { %v200_v36 = vadd.f32 %v196_v34, %v141_v33 }
 0x18d   :  { %v204_v39 = vmax.f32 %v200_v36, 0.0 }
 0x18f   :  { %221 = vmatpush.msrb.mxu2 %v204_v39 }
 0x190   :  { %v175_v41 = vpop.permute.xlu2 %174 }
 0x191   :  { %v193_v43 = vmul.f32 %v607_v30, %v175_v41 }
 0x193   :  { %v197_v44 = vadd.f32 %v193_v43, %v138_v42 }
 0x195   :  { %v201_v47 = vmax.f32 %v197_v44, 0.0  ;;  %v581_v44 = vld [vmem:[%s836_s4 + $0x38] sm:$0xff] }
 0x196   :  { %470 = vmatpush.msra.mxu0 %v581_v44 }
 0x197   :  { %558 = vmatmul.msk.f32.vlgmr.msrb.gmra.mxu0 %vm70_vm0, %v201_v47 }
 0x198   :  { %v185_v48 = vpop.permute.xlu1 %184  ;;  %471 = vmatpush.msra.mxu0 %v580_v45 }
 0x199   :  { %v195_v50 = vmul.f32 %v607_v30, %v185_v48 }
 0x19b   :  { %v199_v51 = vadd.f32 %v195_v50, %v140_v49 }
 0x19d   :  { %v203_v54 = vmax.f32 %v199_v51, 0.0 }
 0x19f   :  { %222 = vmatpush.msrb.mxu2 %v203_v54 }
 0x1a0   :  { %v180_v55 = vpop.permute.xlu1 %179 }
 0x1a1   :  { %v194_v57 = vmul.f32 %v607_v30, %v180_v55 }
 0x1a3   :  { %v198_v58 = vadd.f32 %v194_v57, %v139_v56 }
 0x1a5   :  { %v202_v59 = vmax.f32 %v198_v58, 0.0 }
 0x1a7   :  { %223 = vmatpush.msrb.mxu2 %v202_v59  ;;  %559 = vmatmul.msk.f32.gmra.mxu0 %vm70_vm0, %v202_v59 }
 0x1a9   :  { %224 = vmatpush.msrb.mxu2 %v201_v47 }
 0x1aa   :  { %546 = vmatmul.msk.f32.vlgmr.msrb.gmra.mxu2 %vm70_vm0, %v683_v5 }
 0x1ab   :  { %383 = vmatpush.msra.mxu2 %v569_v4 }
 0x1ad   :  { %384 = vmatpush.msra.mxu2 %v568_v9 }
 0x1af   :  { %560 = vmatmul.msk.f32.gmra.mxu0 %vm70_vm0, %v203_v54  ;;  %385 = vmatpush.msra.mxu2 %v567_v10 }
 0x1b1   :  { %386 = vmatpush.msra.mxu2 %v566_v11 }
 0x1b2   :  { %547 = vmatmul.msk.f32.gmra.mxu2 %vm70_vm0, %v691_v7 }
 0x1b7   :  { %561 = vmatmul.msk.f32.gmra.mxu0 %vm70_vm0, %v204_v39 }
 0x1ba   :  { %548 = vmatmul.msk.f32.gmra.mxu2 %vm70_vm0, %v685_v6 }
 0x1c2   :  { %549 = vmatmul.msk.f32.gmra.mxu2 %vm70_vm0, %v693_v8 }
 0x214   :  { %v313_v21 = vpop.f32.mrf.mxu0 }
 0x224   :  { %v316_v26 = vpop.f32.mrf.mxu0 }
 0x22c   :  { %v319_v33 = vpop.f32.mrf.mxu0 }
 0x22d   :  { %v226_v0 = vpop.f32.mrf.mxu2 }
 0x22e   :  { %554 = vmatmul.msk.f32.vlgmr.msrb.gmra.mxu3 %vm70_vm0, %v226_v0 }
 0x234   :  { %v322_v39 = vpop.f32.mrf.mxu0 }
 0x235   :  { %v229_v1 = vpop.f32.mrf.mxu2 }
 0x236   :  { %555 = vmatmul.msk.f32.gmra.mxu3 %vm70_vm0, %v229_v1 }
 0x23d   :  { %v232_v2 = vpop.f32.mrf.mxu2 }
 0x23e   :  { %556 = vmatmul.msk.f32.gmra.mxu3 %vm70_vm0, %v232_v2 }
 0x245   :  { %v235_v3 = vpop.f32.mrf.mxu2 }
 0x246   :  { %557 = vmatmul.msk.f32.gmra.mxu3 %vm70_vm0, %v235_v3  ;;  %337 = vmatpush.msrb.mxu1 %v235_v3 }
 0x248   :  { %338 = vmatpush.msrb.mxu1 %v232_v2 }
 0x24a   :  { %339 = vmatpush.msrb.mxu1 %v229_v1 }
 0x24c   :  { %340 = vmatpush.msrb.mxu1 %v226_v0 }
 0x24d   :  { %562 = vmatmul.msk.f32.vlgmr.msrb.gmra.mxu1 %vm70_vm0, %v683_v5 }
 0x24e   :  { %511 = vmatpush.msra.mxu1 %v411_v12 }
 0x250   :  { %512 = vmatpush.msra.mxu1 %v410_v17 }
 0x252   :  { %513 = vmatpush.msra.mxu1 %v409_v18 }
 0x254   :  { %514 = vmatpush.msra.mxu1 %v408_v19 }
 0x255   :  { %563 = vmatmul.msk.f32.gmra.mxu1 %vm70_vm0, %v691_v7 }
 0x25d   :  { %564 = vmatmul.msk.f32.gmra.mxu1 %vm70_vm0, %v685_v6 }
 0x265   :  { %565 = vmatmul.msk.f32.gmra.mxu1 %vm70_vm0, %v693_v8 }
 0x2b1   :  { %v272_v20 = vpop.f32.mrf.mxu3 }
 0x2b2   :  { %v314_v22 = vadd.f32 %v313_v21, %v272_v20 }
 0x2b9   :  { %v275_v23 = vpop.f32.mrf.mxu3 }
 0x2ba   :  { %v317_v28 = vadd.f32 %v316_v26, %v275_v23 }
 0x2c1   :  { %v278_v31 = vpop.f32.mrf.mxu3 }
 0x2c2   :  { %v320_v34 = vadd.f32 %v319_v33, %v278_v31 }
 0x2c9   :  { %v281_v38 = vpop.f32.mrf.mxu3 }
 0x2ca   :  { %v342_v13 = vpop.f32.mrf.mxu1  ;;  %v323_v40 = vadd.f32 %v322_v39, %v281_v38 }
 0x2cb   :  { %570 = vmatmul.msk.f32.vlgmr.msra.gmra.mxu2 %vm70_vm0, %v342_v13 }
 0x2d2   :  { %v345_v14 = vpop.f32.mrf.mxu1 }
 0x2d3   :  { %571 = vmatmul.msk.f32.gmra.mxu2 %vm70_vm0, %v345_v14 }
 0x2da   :  { %v348_v15 = vpop.f32.mrf.mxu1 }
 0x2db   :  { %572 = vmatmul.msk.f32.gmra.mxu2 %vm70_vm0, %v348_v15 }
 0x2e2   :  { %v351_v16 = vpop.f32.mrf.mxu1 }
 0x2e3   :  { %573 = vmatmul.msk.f32.gmra.mxu2 %vm70_vm0, %v351_v16 }
 0x34e   :  { %v388_v24 = vpop.f32.mrf.mxu2 }
 0x34f   :  { %v400_v25 = vadd.f32 %v388_v24, %v314_v22 }
 0x351   :  { %v404_v27 = vmax.f32 %v400_v25, 0.0 }
 0x353   :  { %586 = vmatmul.msk.f32.vlgmr.msra.gmra.mxu1 %vm70_vm0, %v404_v27 }
 0x356   :  { %v391_v29 = vpop.f32.mrf.mxu2 }
 0x357   :  { %v401_v30 = vadd.f32 %v391_v29, %v317_v28 }
 0x359   :  { %v405_v32 = vmax.f32 %v401_v30, 0.0 }
 0x35b   :  { %587 = vmatmul.msk.f32.gmra.mxu1 %vm70_vm0, %v405_v32 }
 0x35e   :  { %v394_v35 = vpop.f32.mrf.mxu2 }
 0x35f   :  { %v402_v36 = vadd.f32 %v394_v35, %v320_v34 }
 0x361   :  { %v406_v37 = vmax.f32 %v402_v36, 0.0 }
 0x363   :  { %588 = vmatmul.msk.f32.gmra.mxu1 %vm70_vm0, %v406_v37 }
 0x366   :  { %v397_v41 = vpop.f32.mrf.mxu2 }
 0x367   :  { %v403_v42 = vadd.f32 %v397_v41, %v323_v40 }
 0x369   :  { %v407_v43 = vmax.f32 %v403_v42, 0.0 }
 0x36b   :  { %424 = vmatpush.msra.mxu3 %v407_v43  ;;  %589 = vmatmul.msk.f32.gmra.mxu1 %vm70_vm0, %v407_v43 }
 0x36d   :  { %425 = vmatpush.msra.mxu3 %v406_v37 }
 0x36f   :  { %426 = vmatpush.msra.mxu3 %v405_v32 }
 0x371   :  { %427 = vmatpush.msra.mxu3 %v404_v27 }
 0x372   :  { %574 = vmatmul.msk.f32.vlgmr.msra.gmra.mxu3 %vm70_vm0, %v683_v5  ;;  %v579_v5 = vld [vmem:[%s836_s4 + $0x28] sm:$0xff] }
 0x373   :  { %472 = vmatpush.msra.mxu0 %v579_v5 }
 0x37a   :  { %575 = vmatmul.msk.f32.gmra.mxu3 %vm70_vm0, %v691_v7 }
 0x382   :  { %576 = vmatmul.msk.f32.gmra.mxu3 %vm70_vm0, %v685_v6  ;;  %v578_v6 = vld [vmem:[%s836_s4 + $0x20] sm:$0xff] }
 0x383   :  { %473 = vmatpush.msra.mxu0 %v578_v6 }
 0x38a   :  { %577 = vmatmul.msk.f32.gmra.mxu3 %vm70_vm0, %v693_v8 }
 0x3d0   :  { %v516_v48 = vpop.f32.mrf.mxu1 }
 0x3d8   :  { %v519_v51 = vpop.f32.mrf.mxu1 }
 0x3e0   :  { %v522_v54 = vpop.f32.mrf.mxu1 }
 0x3e8   :  { %v525_v57 = vpop.f32.mrf.mxu1 }
 0x3f5   :  { %v429_v7 = vpop.f32.mrf.mxu3 }
 0x3f6   :  { %582 = vmatmul.msk.f32.vlgmr.msra.gmra.mxu0 %vm70_vm0, %v429_v7 }
 0x3fd   :  { %v432_v8 = vpop.f32.mrf.mxu3 }
 0x3fe   :  { %583 = vmatmul.msk.f32.gmra.mxu0 %vm70_vm0, %v432_v8 }
 0x405   :  { %v435_v46 = vpop.f32.mrf.mxu3 }
 0x406   :  { %584 = vmatmul.msk.f32.gmra.mxu0 %vm70_vm0, %v435_v46 }
 0x40d   :  { %v438_v47 = vpop.f32.mrf.mxu3 }
 0x40e   :  { %585 = vmatmul.msk.f32.gmra.mxu0 %vm70_vm0, %v438_v47 }
 0x473   :  { %v475_v49 = vpop.f32.mrf.mxu0 }
 0x474   :  { %v517_v50 = vadd.f32 %v516_v48, %v475_v49 }
 0x476   :  { %529 = vst.msk [vmem:[%s837_s5] sm:$0xff] %vm528_vm1, %v517_v50 }
 0x47b   :  { %v478_v52 = vpop.f32.mrf.mxu0 }
 0x47c   :  { %v520_v53 = vadd.f32 %v519_v51, %v478_v52 }
 0x47e   :  { %530 = vst.msk [vmem:[%s837_s5 + $0x8] sm:$0xff] %vm528_vm1, %v520_v53 }
 0x483   :  { %v481_v55 = vpop.f32.mrf.mxu0 }
 0x484   :  { %v523_v56 = vadd.f32 %v522_v54, %v481_v55 }
 0x486   :  { %531 = vst.msk [vmem:[%s837_s5 + $0x10] sm:$0xff] %vm528_vm1, %v523_v56 }
 0x48b   :  { %v484_v58 = vpop.f32.mrf.mxu0 }
 0x48c   :  { %v526_v59 = vadd.f32 %v525_v57, %v484_v58 }
 0x48e   :  { %532 = vst.msk [vmem:[%s837_s5 + $0x18] sm:$0xff] %vm528_vm1, %v526_v59 }
 0x48f   :  { %537 = vsyncpa [#allocation3], 1 }

</bundles_post_ra>
